<compile_context>
chip_gen: v7x
topology: tpu7x:2x2x1
jax: 0.10.0
libtpu: 0.0.40
codegen_flags: <defaults>
</compile_context>

<pallas_src>
import jax
import jax.numpy as jnp
from jax import lax
from jax.experimental import pallas as pl
from jax.experimental.pallas import tpu as pltpu

X_DIM = 8
D_DIM = 32
D_LAYERS = 3
BATCH = 2

DEFAULT_TM = 8192          # batch tile (lane / MXU-N axis); multiple of 256
SINGLE_TILE_MAX = 1024     # below this, one grid step amortizes overhead best


def discriminator_kernel(x_ref, w0_ref, b0_ref, wh_ref, bh_ref, wl_ref, bl_ref, o_ref):
    # x_ref: (TM, X_DIM) batch-major tile (straight contiguous DMA from HBM).
    # 1st_layer: h = W0 @ x^T + b0  -> feature-major (D_DIM, TM), batch on lanes.
    x_bf = x_ref[...].astype(jnp.bfloat16)
    h = lax.dot_general(
        w0_ref[...], x_bf,
        dimension_numbers=(((1,), (1,)), ((), ())),   # contract the feature axis (A @ B^T)
        preferred_element_type=jnp.float32,
    ) + b0_ref[...]
    # hidden layers: [ReLU -> Linear(d_dim, d_dim)] * d_layers (statically unrolled).
    for i in range(D_LAYERS):
        h = jnp.maximum(h, 0.0)                        # ReLU + bias stay f32 on the VPU
        h = jnp.dot(wh_ref[i], h.astype(jnp.bfloat16),
                    preferred_element_type=jnp.float32) + bh_ref[i]
    # last_activation + last_layer: Linear(d_dim, 1) -> lane-dense (1, TM) slab.
    h = jnp.maximum(h, 0.0)
    o_ref[...] = jnp.dot(wl_ref[...], h.astype(jnp.bfloat16),
                         preferred_element_type=jnp.float32) + bl_ref[...]


def _const_spec(shape):
    """Full-array block whose block index never changes -> fetched once, VMEM-resident."""
    nd = len(shape)
    return pl.BlockSpec(shape, lambda i, _nd=nd: (0,) * _nd)


def _round_up(n, m):
    return ((n + m - 1) // m) * m


def _pick_tm(b, requested=DEFAULT_TM):
    """Batch tile size.

    * b <= SINGLE_TILE_MAX: one block covering the whole batch (block == full array,
      so no (8,128) divisibility requirement and no padding / host copies).
    * larger b: tiles of `requested` (multiple of 256), but never fewer than 2 tiles
      so the 'parallel' batch axis can use both v7x TensorCores.
    """
    requested = max(256, (requested // 256) * 256)
    if b <= SINGLE_TILE_MAX:
        return b
    return min(requested, _round_up(pl.cdiv(b, 2), 256))


def discriminator_forward(x, w0, b0, wh, bh, wl, bl, tm=None):
    """x: (B, X_DIM) float32.  Weights in PyTorch (out, in) layout, biases (out, 1)."""
    B, x_dim = x.shape
    assert x_dim == X_DIM

    tm = _pick_tm(B, DEFAULT_TM if tm is None else tm)
    num_tiles = pl.cdiv(B, tm)

    # One-time bf16 cast of the (tiny, VMEM-resident) weights; biases stay f32.
    bf = jnp.bfloat16
    w0b, whb, wlb = w0.astype(bf), wh.astype(bf), wl.astype(bf)

    flops = 2 * B * (X_DIM * D_DIM + D_LAYERS * D_DIM * D_DIM + D_DIM)
    bytes_accessed = (B * (X_DIM * 4 + 4)                      # x in, out
                      + 2 * (w0b.size + whb.size + wlb.size)   # bf16 weights
                      + 4 * (b0.size + bh.size + bl.size))     # f32 biases
    cost = pl.CostEstimate(flops=int(flops), transcendentals=0,
                           bytes_accessed=int(bytes_accessed))

    out_t = pl.pallas_call(
        discriminator_kernel,
        out_shape=jax.ShapeDtypeStruct((1, B), jnp.float32),
        grid=(num_tiles,),
        in_specs=[
            pl.BlockSpec((tm, X_DIM), lambda i: (i, 0)),   # x tile      (TM, 8)
            _const_spec(w0b.shape),                        # W0          (d_dim, x_dim)   bf16
            _const_spec(b0.shape),                         # b0          (d_dim, 1)       f32
            _const_spec(whb.shape),                        # Wh stack    (L, d_dim, d_dim) bf16
            _const_spec(bh.shape),                         # bh stack    (L, d_dim, 1)    f32
            _const_spec(wlb.shape),                        # W_last      (1, d_dim)       bf16
            _const_spec(bl.shape),                         # b_last      (1, 1)           f32
        ],
        out_specs=pl.BlockSpec((1, tm), lambda i: (0, i)),  # lane-dense (1, TM) slab
        compiler_params=pltpu.CompilerParams(
            dimension_semantics=("parallel",),              # shard batch tiles across TCs (v7x)
        ),
        cost_estimate=cost,
    )(x, w0b, b0, whb, bh, wlb, bl)

    # (1, B) -> (B, 1): pure relabel, no data reordering.
    return out_t.reshape(B, 1)


def init_params(key):
    """PyTorch-like uniform(-1/sqrt(fan_in), 1/sqrt(fan_in)) init, weights in (out, in)."""
    ks = jax.random.split(key, 8)

    def lin(k, fan_in, fan_out):
        kw, kb = jax.random.split(k)
        bound = 1.0 / jnp.sqrt(float(fan_in))
        w = jax.random.uniform(kw, (fan_out, fan_in), jnp.float32, -bound, bound)
        b = jax.random.uniform(kb, (fan_out, 1), jnp.float32, -bound, bound)
        return w, b

    w0, b0 = lin(ks[0], X_DIM, D_DIM)
    whs, bhs = [], []
    for i in range(D_LAYERS):
        w, b = lin(ks[1 + i], D_DIM, D_DIM)
        whs.append(w)
        bhs.append(b)
    wh = jnp.stack(whs, axis=0)                           # (d_layers, d_dim, d_dim)
    bh = jnp.stack(bhs, axis=0)                           # (d_layers, d_dim, 1)
    wl, bl = lin(ks[1 + D_LAYERS], D_DIM, 1)              # (1, d_dim), (1, 1)
    return w0, b0, wh, bh, wl, bl


def reference_forward(x, w0, b0, wh, bh, wl, bl):
    """Plain-JAX reference with the same bf16-operand / f32-accumulate math."""
    bf, f32 = jnp.bfloat16, jnp.float32
    h = jnp.dot(x.astype(bf), w0.astype(bf).T, preferred_element_type=f32) + b0[:, 0]
    for i in range(D_LAYERS):
        h = jnp.maximum(h, 0.0)
        h = jnp.dot(h.astype(bf), wh[i].astype(bf).T, preferred_element_type=f32) + bh[i, :, 0]
    h = jnp.maximum(h, 0.0)
    return jnp.dot(h.astype(bf), wl.astype(bf).T, preferred_element_type=f32) + bl[:, 0]


if __name__ == "__main__":
    key = jax.random.PRNGKey(0)
    kx, kp = jax.random.split(key)
    x = jax.random.normal(kx, (BATCH, X_DIM), dtype=jnp.float32)
    params = init_params(kp)

    out = discriminator_forward(x, *params)
    out = jax.block_until_ready(out)

    ref = reference_forward(x, *params)
    assert out.shape == (BATCH, 1)
    # bf16 MXU operands (per perf review) -> compare against the matching-precision
    # reference with a correspondingly loosened tolerance.
    assert jnp.allclose(out, ref, atol=1e-2, rtol=1e-2)
    print("KERNEL_OK")
</pallas_src>

<mosaic_0001>
module attributes {stable_mosaic.version = 11 : i64} {
  func.func @discriminator_kernel(%arg0: i32, %arg1: memref<2x8xf32, #tpu.memory_space<vmem>>, %arg2: memref<32x8xbf16, #tpu.memory_space<vmem>>, %arg3: memref<32x1xf32, #tpu.memory_space<vmem>>, %arg4: memref<3x32x32xbf16, #tpu.memory_space<vmem>>, %arg5: memref<3x32x1xf32, #tpu.memory_space<vmem>>, %arg6: memref<1x32xbf16, #tpu.memory_space<vmem>>, %arg7: memref<1x1xf32, #tpu.memory_space<vmem>>, %arg8: memref<1x2xf32, #tpu.memory_space<vmem>>) attributes {dimension_semantics = [#tpu.dimension_semantics<parallel>], iteration_bounds = array<i64: 1>, scalar_prefetch = 0 : i64, scratch_operands = 0 : i64, tpu.core_type = #tpu.core_type<tc>, window_params = [{transform_indices = @transform_0, window_bounds = array<i64: 2, 8>}, {pipeline_mode = #tpu.pipeline_mode<synchronous>, transform_indices = @transform_1, window_bounds = array<i64: 32, 8>}, {pipeline_mode = #tpu.pipeline_mode<synchronous>, transform_indices = @transform_2, window_bounds = array<i64: 32, 1>}, {pipeline_mode = #tpu.pipeline_mode<synchronous>, transform_indices = @transform_3, window_bounds = array<i64: 3, 32, 32>}, {pipeline_mode = #tpu.pipeline_mode<synchronous>, transform_indices = @transform_4, window_bounds = array<i64: 3, 32, 1>}, {pipeline_mode = #tpu.pipeline_mode<synchronous>, transform_indices = @transform_5, window_bounds = array<i64: 1, 32>}, {pipeline_mode = #tpu.pipeline_mode<synchronous>, transform_indices = @transform_6, window_bounds = array<i64: 1, 1>}, {transform_indices = @transform_7, window_bounds = array<i64: 1, 2>}]} {
    %c0 = arith.constant 0 : index
    %c0_0 = arith.constant 0 : index
    %0 = vector.load %arg1[%c0, %c0_0] : memref<2x8xf32, #tpu.memory_space<vmem>>, vector<2x8xf32>
    %1 = arith.truncf %0 : vector<2x8xf32> to vector<2x8xbf16>
    %c0_1 = arith.constant 0 : index
    %c0_2 = arith.constant 0 : index
    %2 = vector.load %arg2[%c0_1, %c0_2] : memref<32x8xbf16, #tpu.memory_space<vmem>>, vector<32x8xbf16>
    %cst = arith.constant dense<0.000000e+00> : vector<32x2xf32>
    %3 = tpu.matmul %2, %1, %cst {dimension_numbers = #tpu.dot_dimension_numbers<[1], [1], [0], [0], [0, 0, 1, 0], [], []>} : vector<32x8xbf16>, vector<2x8xbf16>, vector<32x2xf32> -> vector<32x2xf32>
    %c0_3 = arith.constant 0 : index
    %c0_4 = arith.constant 0 : index
    %4 = vector.load %arg3[%c0_3, %c0_4] : memref<32x1xf32, #tpu.memory_space<vmem>>, vector<32x1xf32>
    %5 = vector.broadcast %4 : vector<32x1xf32> to vector<32x2xf32>
    %6 = arith.addf %3, %5 : vector<32x2xf32>
    %cst_5 = arith.constant 0.000000e+00 : f32
    %7 = vector.broadcast %cst_5 : f32 to vector<32x2xf32>
    %8 = arith.maximumf %6, %7 : vector<32x2xf32>
    %c0_6 = arith.constant 0 : index
    %c0_7 = arith.constant 0 : index
    %c0_8 = arith.constant 0 : index
    %9 = vector.load %arg4[%c0_6, %c0_7, %c0_8] : memref<3x32x32xbf16, #tpu.memory_space<vmem>>, vector<1x32x32xbf16>
    %10 = vector.shape_cast %9 : vector<1x32x32xbf16> to vector<32x32xbf16>
    %11 = arith.truncf %8 : vector<32x2xf32> to vector<32x2xbf16>
    %cst_9 = arith.constant dense<0.000000e+00> : vector<32x2xf32>
    %12 = tpu.matmul %10, %11, %cst_9 {dimension_numbers = #tpu.dot_dimension_numbers<[1], [0], [0], [1], [0, 0, 1, 1], [], []>} : vector<32x32xbf16>, vector<32x2xbf16>, vector<32x2xf32> -> vector<32x2xf32>
    %c0_10 = arith.constant 0 : index
    %c0_11 = arith.constant 0 : index
    %c0_12 = arith.constant 0 : index
    %13 = vector.load %arg5[%c0_10, %c0_11, %c0_12] : memref<3x32x1xf32, #tpu.memory_space<vmem>>, vector<1x32x1xf32>
    %14 = vector.shape_cast %13 : vector<1x32x1xf32> to vector<32x1xf32>
    %15 = vector.broadcast %14 : vector<32x1xf32> to vector<32x2xf32>
    %16 = arith.addf %12, %15 : vector<32x2xf32>
    %cst_13 = arith.constant 0.000000e+00 : f32
    %17 = vector.broadcast %cst_13 : f32 to vector<32x2xf32>
    %18 = arith.maximumf %16, %17 : vector<32x2xf32>
    %c1 = arith.constant 1 : index
    %c0_14 = arith.constant 0 : index
    %c0_15 = arith.constant 0 : index
    %19 = vector.load %arg4[%c1, %c0_14, %c0_15] : memref<3x32x32xbf16, #tpu.memory_space<vmem>>, vector<1x32x32xbf16>
    %20 = vector.shape_cast %19 : vector<1x32x32xbf16> to vector<32x32xbf16>
    %21 = arith.truncf %18 : vector<32x2xf32> to vector<32x2xbf16>
    %cst_16 = arith.constant dense<0.000000e+00> : vector<32x2xf32>
    %22 = tpu.matmul %20, %21, %cst_16 {dimension_numbers = #tpu.dot_dimension_numbers<[1], [0], [0], [1], [0, 0, 1, 1], [], []>} : vector<32x32xbf16>, vector<32x2xbf16>, vector<32x2xf32> -> vector<32x2xf32>
    %c1_17 = arith.constant 1 : index
    %c0_18 = arith.constant 0 : index
    %c0_19 = arith.constant 0 : index
    %23 = vector.load %arg5[%c1_17, %c0_18, %c0_19] : memref<3x32x1xf32, #tpu.memory_space<vmem>>, vector<1x32x1xf32>
    %24 = vector.shape_cast %23 : vector<1x32x1xf32> to vector<32x1xf32>
    %25 = vector.broadcast %24 : vector<32x1xf32> to vector<32x2xf32>
    %26 = arith.addf %22, %25 : vector<32x2xf32>
    %cst_20 = arith.constant 0.000000e+00 : f32
    %27 = vector.broadcast %cst_20 : f32 to vector<32x2xf32>
    %28 = arith.maximumf %26, %27 : vector<32x2xf32>
    %c2 = arith.constant 2 : index
    %c0_21 = arith.constant 0 : index
    %c0_22 = arith.constant 0 : index
    %29 = vector.load %arg4[%c2, %c0_21, %c0_22] : memref<3x32x32xbf16, #tpu.memory_space<vmem>>, vector<1x32x32xbf16>
    %30 = vector.shape_cast %29 : vector<1x32x32xbf16> to vector<32x32xbf16>
    %31 = arith.truncf %28 : vector<32x2xf32> to vector<32x2xbf16>
    %cst_23 = arith.constant dense<0.000000e+00> : vector<32x2xf32>
    %32 = tpu.matmul %30, %31, %cst_23 {dimension_numbers = #tpu.dot_dimension_numbers<[1], [0], [0], [1], [0, 0, 1, 1], [], []>} : vector<32x32xbf16>, vector<32x2xbf16>, vector<32x2xf32> -> vector<32x2xf32>
    %c2_24 = arith.constant 2 : index
    %c0_25 = arith.constant 0 : index
    %c0_26 = arith.constant 0 : index
    %33 = vector.load %arg5[%c2_24, %c0_25, %c0_26] : memref<3x32x1xf32, #tpu.memory_space<vmem>>, vector<1x32x1xf32>
    %34 = vector.shape_cast %33 : vector<1x32x1xf32> to vector<32x1xf32>
    %35 = vector.broadcast %34 : vector<32x1xf32> to vector<32x2xf32>
    %36 = arith.addf %32, %35 : vector<32x2xf32>
    %cst_27 = arith.constant 0.000000e+00 : f32
    %37 = vector.broadcast %cst_27 : f32 to vector<32x2xf32>
    %38 = arith.maximumf %36, %37 : vector<32x2xf32>
    %c0_28 = arith.constant 0 : index
    %c0_29 = arith.constant 0 : index
    %39 = vector.load %arg6[%c0_28, %c0_29] : memref<1x32xbf16, #tpu.memory_space<vmem>>, vector<1x32xbf16>
    %40 = arith.truncf %38 : vector<32x2xf32> to vector<32x2xbf16>
    %cst_30 = arith.constant dense<0.000000e+00> : vector<1x2xf32>
    %41 = tpu.matmul %39, %40, %cst_30 {dimension_numbers = #tpu.dot_dimension_numbers<[1], [0], [0], [1], [0, 0, 1, 1], [], []>} : vector<1x32xbf16>, vector<32x2xbf16>, vector<1x2xf32> -> vector<1x2xf32>
    %c0_31 = arith.constant 0 : index
    %c0_32 = arith.constant 0 : index
    %42 = vector.load %arg7[%c0_31, %c0_32] : memref<1x1xf32, #tpu.memory_space<vmem>>, vector<1x1xf32>
    %43 = vector.broadcast %42 : vector<1x1xf32> to vector<1x2xf32>
    %44 = arith.addf %41, %43 : vector<1x2xf32>
    %c0_33 = arith.constant 0 : index
    %c0_34 = arith.constant 0 : index
    %45 = vector.load %arg8[%c0_33, %c0_34] : memref<1x2xf32, #tpu.memory_space<vmem>>, vector<1x2xf32>
    tpu.vector_store %arg8[%c0_33, %c0_34], %44 {strides = array<i32>} : memref<1x2xf32, #tpu.memory_space<vmem>>, vector<1x2xf32>,
    return
  }
  func.func @transform_0(%arg0: i32) -> (i32, i32) {
    %c0_i32 = arith.constant 0 : i32
    %c0_i32_0 = arith.constant 0 : i32
    return %arg0, %c0_i32 : i32, i32
  }
  func.func @transform_1(%arg0: i32) -> (i32, i32) {
    %c0_i32 = arith.constant 0 : i32
    %c0_i32_0 = arith.constant 0 : i32
    %c0_i32_1 = arith.constant 0 : i32
    return %c0_i32, %c0_i32_0 : i32, i32
  }
  func.func @transform_2(%arg0: i32) -> (i32, i32) {
    %c0_i32 = arith.constant 0 : i32
    %c0_i32_0 = arith.constant 0 : i32
    %c0_i32_1 = arith.constant 0 : i32
    return %c0_i32, %c0_i32_0 : i32, i32
  }
  func.func @transform_3(%arg0: i32) -> (i32, i32, i32) {
    %c0_i32 = arith.constant 0 : i32
    %c0_i32_0 = arith.constant 0 : i32
    %c0_i32_1 = arith.constant 0 : i32
    %c0_i32_2 = arith.constant 0 : i32
    return %c0_i32, %c0_i32_0, %c0_i32_1 : i32, i32, i32
  }
  func.func @transform_4(%arg0: i32) -> (i32, i32, i32) {
    %c0_i32 = arith.constant 0 : i32
    %c0_i32_0 = arith.constant 0 : i32
    %c0_i32_1 = arith.constant 0 : i32
    %c0_i32_2 = arith.constant 0 : i32
    return %c0_i32, %c0_i32_0, %c0_i32_1 : i32, i32, i32
  }
  func.func @transform_5(%arg0: i32) -> (i32, i32) {
    %c0_i32 = arith.constant 0 : i32
    %c0_i32_0 = arith.constant 0 : i32
    %c0_i32_1 = arith.constant 0 : i32
    return %c0_i32, %c0_i32_0 : i32, i32
  }
  func.func @transform_6(%arg0: i32) -> (i32, i32) {
    %c0_i32 = arith.constant 0 : i32
    %c0_i32_0 = arith.constant 0 : i32
    %c0_i32_1 = arith.constant 0 : i32
    return %c0_i32, %c0_i32_0 : i32, i32
  }
  func.func @transform_7(%arg0: i32) -> (i32, i32) {
    %c0_i32 = arith.constant 0 : i32
    %c0_i32_0 = arith.constant 0 : i32
    return %c0_i32, %arg0 : i32, i32
  }
}

</mosaic_0001>

<bundles_post_ra>
// kernel: tpu_custom_call.1
= control target key start
LH: loop header
LB: loop body
LE: loop exit
PB: predicated region body
PF: predicated region fallthrough
CT: control target
= control target key end

     0   :  { %s783_s0 = inlined_call_operand.vmem [shape: f32[2,8], index: 0, kind: input, shape index: {}]   ;;  %s784_s1 = inlined_call_operand.vmem [shape: bf16[32,8], index: 1, kind: input, shape index: {}]   ;;  %s785_s2 = inlined_call_operand.vmem [shape: f32[32,1], index: 2, kind: input, shape index: {}]   ;;  %s786_s3 = inlined_call_operand.vmem [shape: bf16[3,32,32], index: 3, kind: input, shape index: {}]   ;;  %s787_s4 = inlined_call_operand.vmem [shape: f32[3,32,1], index: 4, kind: input, shape index: {}]   ;;  %s788_s5 = inlined_call_operand.vmem [shape: bf16[1,32], index: 5, kind: input, shape index: {}]   ;;  %s789_s6 = inlined_call_operand.<no memory space> [shape: f32[1,1], index: 6, kind: input, shape index: {}]   ;;  %s790_s7 = inlined_call_operand.hbm [shape: f32[1,2], index: 7, kind: output, shape index: {}]  }
   0x1   :  { %v12_v0 = vstv %s789_s6 }
   0x2   :  { %13 = vst [vmem:[#allocation2] sm:$0x1] %v12_v0 }
   0x3   :  { %v30_v1 = vld [vmem:[%s783_s0] sm:$0x3]  ;;  %vm70_vm0 = vcmask 64512   ;;  %v635_v6 = vmov 0   ;;  %v38_v7 = vld [vmem:[%s785_s2 + $0x10] sm:$0xff]  ;;  %v37_v8 = vld [vmem:[%s785_s2 + $0x8] sm:$0xff] }
   0x4   :  { %v603_v2 = vld [vmem:[%s784_s1] sm:$0xff]   ;;  %v31_v3 = vpack.c.bf16 %v30_v1, %v30_v1  ;;  %601 = vset.pattern.permute.xlu0 %v635_v6  ;;  %602 = vset.pattern.permute.xlu1 %v635_v6  ;;  %v604_v9 = vld [vmem:[%s784_s1 + $0x8] sm:$0xff]   ;;  %v39_v11 = vld [vmem:[%s785_s2 + $0x18] sm:$0xff] }
   0x5   :  { %560 = vmatprep.mubr.msk.bf16.mxu0 %vm70_vm0, %v603_v2  ;;  %v36_v4 = vld [vmem:[%s785_s2] sm:$0xff]  ;;  %52 = vperm.xlu1 %602, %v38_v7   ;;  %v140_v12 = vld [vmem:[%s787_s4 + $0x8] sm:$0xff] }
   0x6   :  { %596 = vmatprep.subr.msk.bf16.mxu0 %vm70_vm0, %v31_v3  ;;  %v78_v5 = vsel %vm70_vm0, %v31_v3, 0  ;;  %42 = vperm.xlu0 %601, %v36_v4   ;;  %v139_v10 = vld [vmem:[%s787_s4] sm:$0xff] }
   0x7   :  { %559 = vmatpush3.bf16.xpose.msra.mxu0 %v78_v5 }
   0x9   :  { %57 = vperm.xlu1 %602, %v39_v11  }
   0xa   :  { %47 = vperm.xlu0 %601, %v37_v8  }
   0xe   :  { %561 = vmatmul.mubr.msk.bf16.vlgmr.msra.gmra.mrb[0].mxu0 %vm70_vm0, %v604_v9  ;;  %145 = vperm.xlu0 %601, %v139_v10  }
   0xf   :  { %14 = vsyncpa [#allocation4], 0  ;;  %v141_v13 = vld [vmem:[%s787_s4 + $0x10] sm:$0xff]  ;;  %150 = vperm.xlu1 %602, %v140_v12   ;;  %v142_v14 = vld [vmem:[%s787_s4 + $0x18] sm:$0xff]  ;;  %vm173_vm1 = vcmask 261120   ;;  %vm637_vm2 = vmmov 0  }
  0x10   :  { %v519_v15 = vld [vmem:[%s787_s4 + $0x20] sm:$0xff]  ;;  %v520_v16 = vld [vmem:[%s787_s4 + $0x28] sm:$0xff]  ;;  %v521_v17 = vld [vmem:[%s787_s4 + $0x30] sm:$0xff]  ;;  %s638_s22 = smov [#allocation3]   ;;  %vm491_vm3 = vcmask 8192  }
  0x11   :  { %v522_v18 = vld [vmem:[%s787_s4 + $0x38] sm:$0xff]  ;;  %v531_v19 = vld [vmem:[%s787_s4 + $0x40] sm:$0xff]  ;;  %v532_v20 = vld [vmem:[%s787_s4 + $0x48] sm:$0xff]  ;;  %s499_s23 = sshll.u32 %s638_s22, 4  ;;  %s500_s23 = int_to_ptr.vmem [resolvable:$true] %s499_s23 }
  0x12   :  { %155 = vperm.xlu0 %601, %v141_v13   ;;  %v533_v21 = vld [vmem:[%s787_s4 + $0x50] sm:$0xff]  ;;  %v534_v22 = vld [vmem:[%s787_s4 + $0x58] sm:$0xff]  ;;  %v438_v23 = vld [vmem:[#allocation2] sm:$0x1]  ;;  %s611_s24 = scalar_lea.vmem %s500_s23, 16  ;;  %p616_p1 = scmp.lt.s32.totalorder %s500_s23, %s500_s23 }
  0x13   :  { %160 = vperm.xlu1 %602, %v142_v14   ;;  %v605_v24 = vld [vmem:[%s786_s3] sm:$0xff]   ;;  %v606_v43 = vld [vmem:[%s786_s3 + $0x8] sm:$0xff]   ;;  %v607_v44 = vld [vmem:[%s786_s3 + $0x10] sm:$0xff]   ;;  %p612_p0 = scmp.ne.s32.totalorder %s500_s23, %s611_s24 }
  0x14   :  { %568 = vmatprep.mubr.msk.bf16.mxu1 %vm173_vm1, %v605_v24  ;;  %576 = vmatprep.mubr.msk.bf16.mxu0 %vm173_vm1, %v607_v44  ;;  %v608_v63 = vld [vmem:[%s786_s3 + $0x18] sm:$0xff]   ;;  %v609_v0 = vld [vmem:[%s786_s3 + $0x20] sm:$0xff]  }
  0x16   :  { %247 = vperm.xlu0 %601, %v519_v15  }
  0x17   :  { %252 = vperm.xlu1 %602, %v520_v16  }
  0x1a   :  { %257 = vperm.xlu0 %601, %v521_v17  }
  0x1b   :  { %262 = vperm.xlu1 %602, %v522_v18  }
  0x1e   :  { %348 = vperm.xlu0 %601, %v531_v19   ;;  %v610_v19 = vld [vmem:[%s786_s3 + $0x28] sm:$0xff]  }
  0x1f   :  { %353 = vperm.xlu1 %602, %v532_v20   ;;  %v636_v20 = vmov 0.0  }
  0x22   :  { %358 = vperm.xlu0 %601, %v533_v21  }
  0x23   :  { %363 = vperm.xlu1 %602, %v534_v22  }
  0x26   :  { %441 = vperm.xlu0 %601, %v438_v23  }
  0x84   :  { %v53_v25 = vpop.permute.xlu1 %52 }
  0x85   :  { %v43_v26 = vpop.permute.xlu0 %42 }
  0x88   :  { %v58_v30 = vpop.permute.xlu1 %57 }
  0x89   :  { %v48_v33 = vpop.permute.xlu0 %47 }
  0x8d   :  { %v146_v45 = vpop.permute.xlu0 %145 }
  0x8e   :  { %v151_v46 = vpop.permute.xlu1 %150 }
  0x91   :  { %v156_v47 = vpop.permute.xlu0 %155 }
  0x92   :  { %v161_v51 = vpop.permute.xlu1 %160 }
  0x95   :  { %v248_v1 = vpop.permute.xlu0 %247 }
  0x96   :  { %v253_v2 = vpop.permute.xlu1 %252 }
  0x99   :  { %v258_v3 = vpop.permute.xlu0 %257 }
  0x9a   :  { %v263_v7 = vpop.permute.xlu1 %262 }
  0x9d   :  { %v349_v21 = vpop.permute.xlu0 %348 }
  0x9e   :  { %v354_v22 = vpop.permute.xlu1 %353 }
  0xa1   :  { %v359_v23 = vpop.permute.xlu0 %358 }
  0xe1   :  { %v562_v27 = vpop.f32.mrb[0].mxu0 }
  0xe2   :  { %v123_v28 = vadd.f32 %v562_v27, %v53_v25  ;;  %v114_v29 = vpop.f32.mrb[1].mxu0  ;;  %v364_v27 = vpop.permute.xlu1 %363 }
  0xe3   :  { %v115_v31 = vadd.f32 %v114_v29, %v43_v26  ;;  %v563_v32 = vpop.f32.mrb[2].mxu0 }
  0xe4   :  { %v126_v34 = vadd.f32 %v563_v32, %v58_v30  ;;  %v117_v35 = vpop.f32.mrb[3].mxu0  ;;  %v131_v37 = vmax.f32 %v123_v28, 0.0 }
  0xe5   :  { %v118_v36 = vadd.f32 %v117_v35, %v48_v33  ;;  %v129_v39 = vmax.f32 %v115_v31, 0.0 }
  0xe6   :  { %v132_v38 = vmax.f32 %v126_v34, 0.0 }
  0xe7   :  { %v130_v40 = vmax.f32 %v118_v36, 0.0 }
  0xe8   :  { %v138_v41 = vpack.c.bf16 %v132_v38, %v131_v37 }
  0xe9   :  { %v137_v42 = vpack.c.bf16 %v130_v40, %v129_v39  ;;  %v435_v39 = vld [vmem:[%s788_s5] sm:$0x1]  ;;  %v444_v40 = vlaneseq  ;;  %s615_s5 = scalar_lea.vmem %s500_s23, 32 }
  0xea   :  { %p617_p2 = scmp.lt.s32.totalorder %s615_s5, %s611_s24 }
  0xeb   :  { %564 = vmatprep.subr.bf16.mxu1 %v137_v42 }
  0xec   :  { %565 = vmatpush3.bf16.msra.mxu1 %v137_v42  ;;  %p618_p3 = por %p617_p2, %p616_p1 }
  0xed   :  { %566 = vmatprep.subr.bf16.mxu1 %v138_v41 }
  0xee   :  { %p619_p4 = pnand %p618_p3, %p612_p0 }
  0xf0   :  { %567 = vmatpush3.bf16.msra.mxu1 %v138_v41  ;;  %v445_v41 = vshrl.u32 %v444_v40, 7 }
  0xf2   :  { %v446_v42 = vsub.s32 0, %v445_v41 }
  0xf3   :  { %569 = vmatmul.mubr.msk.bf16.vlgmr.msra.gmra.mrb[0].mxu1 %vm173_vm1, %v606_v43  ;;  %v442_v43 = vpop.permute.xlu0 %441 }
  0xf4   :  { %584 = vmatprep.mubr.msk.bf16.mxu1 %vm173_vm1, %v609_v0  ;;  %v447_v44 = vrot.slane %v442_v43, %v446_v42 }
 0x1c6   :  { %v570_v48 = vpop.f32.mrb[0].mxu1 }
 0x1c7   :  { %v223_v49 = vadd.f32 %v570_v48, %v156_v47  ;;  %v214_v50 = vpop.f32.mrb[1].mxu1 }
 0x1c8   :  { %v215_v52 = vadd.f32 %v214_v50, %v146_v45  ;;  %v571_v53 = vpop.f32.mrb[2].mxu1 }
 0x1c9   :  { %v226_v54 = vadd.f32 %v571_v53, %v161_v51  ;;  %v217_v55 = vpop.f32.mrb[3].mxu1  ;;  %v231_v57 = vmax.f32 %v223_v49, 0.0 }
 0x1ca   :  { %v218_v56 = vadd.f32 %v217_v55, %v151_v46  ;;  %v229_v59 = vmax.f32 %v215_v52, 0.0 }
 0x1cb   :  { %v232_v58 = vmax.f32 %v226_v54, 0.0 }
 0x1cc   :  { %v230_v60 = vmax.f32 %v218_v56, 0.0 }
 0x1cd   :  { %v239_v61 = vpack.c.bf16 %v232_v58, %v231_v57 }
 0x1ce   :  { %v238_v62 = vpack.c.bf16 %v230_v60, %v229_v59 }
 0x1d0   :  { %572 = vmatprep.subr.bf16.mxu0 %v238_v62 }
 0x1d1   :  { %573 = vmatpush3.bf16.msra.mxu0 %v238_v62 }
 0x1d2   :  { %574 = vmatprep.subr.bf16.mxu0 %v239_v61 }
 0x1d5   :  { %575 = vmatpush3.bf16.msra.mxu0 %v239_v61 }
 0x1d6   :  { %588 = vmatprep.subr.bf16.mxu0 %v636_v20 }
 0x1d8   :  { %577 = vmatmul.mubr.msk.bf16.vlgmr.msra.gmra.mrb[4].mxu0 %vm173_vm1, %v608_v63 }
 0x1d9   :  { %592 = vmatprep.mubr.msk.bf16.mxu0 %vm637_vm2, %v636_v20 }
 0x2ab   :  { %v578_v4 = vpop.f32.mrb[4].mxu0 }
 0x2ac   :  { %v324_v5 = vadd.f32 %v578_v4, %v258_v3  ;;  %v315_v6 = vpop.f32.mrb[5].mxu0 }
 0x2ad   :  { %v316_v8 = vadd.f32 %v315_v6, %v248_v1  ;;  %v579_v9 = vpop.f32.mrb[6].mxu0 }
 0x2ae   :  { %v327_v10 = vadd.f32 %v579_v9, %v263_v7  ;;  %v318_v11 = vpop.f32.mrb[7].mxu0  ;;  %v332_v13 = vmax.f32 %v324_v5, 0.0 }
 0x2af   :  { %v319_v12 = vadd.f32 %v318_v11, %v253_v2  ;;  %v330_v15 = vmax.f32 %v316_v8, 0.0 }
 0x2b0   :  { %v333_v14 = vmax.f32 %v327_v10, 0.0 }
 0x2b1   :  { %v331_v16 = vmax.f32 %v319_v12, 0.0 }
 0x2b2   :  { %v340_v17 = vpack.c.bf16 %v333_v14, %v332_v13 }
 0x2b3   :  { %v339_v18 = vpack.c.bf16 %v331_v16, %v330_v15 }
 0x2b5   :  { %580 = vmatprep.subr.bf16.mxu1 %v339_v18 }
 0x2b6   :  { %581 = vmatpush3.bf16.msra.mxu1 %v339_v18 }
 0x2b7   :  { %582 = vmatprep.subr.bf16.mxu1 %v340_v17 }
 0x2ba   :  { %583 = vmatpush3.bf16.msra.mxu1 %v340_v17 }
 0x2bd   :  { %585 = vmatmul.mubr.msk.bf16.vlgmr.msra.gmra.mrb[4].mxu1 %vm173_vm1, %v610_v19 }
 0x390   :  { %v586_v24 = vpop.f32.mrb[4].mxu1 }
 0x391   :  { %v425_v25 = vadd.f32 %v586_v24, %v359_v23  ;;  %v416_v26 = vpop.f32.mrb[5].mxu1 }
 0x392   :  { %v417_v28 = vadd.f32 %v416_v26, %v349_v21  ;;  %v587_v29 = vpop.f32.mrb[6].mxu1 }
 0x393   :  { %v428_v30 = vadd.f32 %v587_v29, %v364_v27  ;;  %v419_v31 = vpop.f32.mrb[7].mxu1  ;;  %v433_v33 = vmax.f32 %v425_v25, 0.0 }
 0x394   :  { %v420_v32 = vadd.f32 %v419_v31, %v354_v22  ;;  %v431_v35 = vmax.f32 %v417_v28, 0.0 }
 0x395   :  { %v434_v34 = vmax.f32 %v428_v30, 0.0 }
 0x396   :  { %v432_v36 = vmax.f32 %v420_v32, 0.0 }
 0x397   :  { %v437_v37 = vpack.c.bf16 %v434_v34, %v433_v33 }
 0x398   :  { %v436_v38 = vpack.c.bf16 %v432_v36, %v431_v35 }
 0x39a   :  { %589 = vmatpush3.bf16.msra.mxu0 %v436_v38 }
 0x39b   :  { %590 = vmatprep.subr.bf16.mxu0 %v636_v20 }
 0x39e   :  { %591 = vmatpush3.bf16.msra.mxu0 %v437_v37 }
 0x3a1   :  { %593 = vmatmul.mubr.msk.bf16.vlgmr.msra.gmra.mrb[8].mxu0 %vm173_vm1, %v435_v39 }
 0x474   :  { %v485_v45 = vpop.f32.mrb[8].mxu0 }
 0x475   :  { %v486_v46 = vadd.f32 %v485_v45, %v447_v44  ;;  %v594_v47 = vpop.f32.mrb[9].mxu0 }
 0x476   :  { %v488_v48 = vpop.f32.mrb[10].mxu0 }
 0x477   :  { %v595_v49 = vpop.f32.mrb[11].mxu0  ;;  %492 = vst.msk [vmem:[#allocation3] sm:$0x1] %vm491_vm3, %v486_v46 }
 0x478   :  { %622 = shalt.err (!%p619_p4)
}
 0x479   :  { %s623_s27 = scalar_lea.hbm %s790_s7, 16 }
 0x47a   :  { %p624_p5 = scmp.ne.s32.totalorder %s790_s7, %s623_s27  ;;  %p627_p6 = scmp.lt.u32.totalorder %s623_s27, %s790_s7 }
 0x47c   :  { %p629_p7 = pnand %p627_p6, %p624_p5 }
 0x47e   :  { %632 = shalt.err (!%p629_p7)
}
 0x47f   :  { %502 = dma.vmem_to_hbm [thread:$0]  %s500_s23, 16, %s790_s7, [#allocation4]  }
 0x480   :  { %633 = dma.done.wait [#allocation4], 16  }
 0x481   :  { %634 = vsyncadd [#allocation4], 4294967280 }
 0x482   :  { %506 = vsyncpa [#allocation4], 1 }

</bundles_post_ra>
